<compile_context>
chip_gen: v6e
topology: v6e:2x2x1
jax: 0.10.0
libtpu: 0.0.40
codegen_flags: <defaults>
</compile_context>

<pallas_src>
import jax
import jax.numpy as jnp
from jax.experimental import pallas as pl
from jax.experimental.pallas import tpu as pltpu


# Row offsets (multiples of 8) of each layer inside the packed slabs.
_R12 = 0      # fused hidden1+hidden2 : W12 [40, 4]   rows   0:40
_R3 = 40      # hidden3               : W3  [20, 40]  rows  40:60
_R4 = 64      # hidden4               : W4  [20, 20]  rows  64:84
_R5 = 88      # hidden5               : W5  [20, 20]  rows  88:108
_RO = 112     # output                : Wo  [ 1, 20]  rows 112:113
_SLAB_ROWS = 120
_SLAB_COLS = 128

_TB_MAX = 8192   # batch tile (lane) width per grid step


def _mlp_kernel(x_ref, w_ref, b_ref, out_ref):
    # x_ref: [4, TB]  (rows 0-1 = input1^T, rows 2-3 = input2^T)
    x = x_ref[...]

    # Fused hidden1 + hidden2 via block-diagonal W12 -> rows are concat(h1, h2).
    h = jnp.maximum(
        jnp.dot(w_ref[_R12:_R12 + 40, 0:4], x,
                preferred_element_type=jnp.float32)
        + b_ref[_R12:_R12 + 40, :], 0.0)                          # [40, TB]

    # hidden3 (40 -> 20), ReLU
    h = jnp.maximum(
        jnp.dot(w_ref[_R3:_R3 + 20, 0:40], h,
                preferred_element_type=jnp.float32)
        + b_ref[_R3:_R3 + 20, :], 0.0)                            # [20, TB]

    # hidden4 (20 -> 20), ReLU
    h = jnp.maximum(
        jnp.dot(w_ref[_R4:_R4 + 20, 0:20], h,
                preferred_element_type=jnp.float32)
        + b_ref[_R4:_R4 + 20, :], 0.0)

    # hidden5 (20 -> 20), ReLU
    h = jnp.maximum(
        jnp.dot(w_ref[_R5:_R5 + 20, 0:20], h,
                preferred_element_type=jnp.float32)
        + b_ref[_R5:_R5 + 20, :], 0.0)

    # output (20 -> 1), no activation; lane-dense [1, TB] store.
    out_ref[...] = (
        jnp.dot(w_ref[_RO:_RO + 1, 0:20], h,
                preferred_element_type=jnp.float32)
        + b_ref[_RO:_RO + 1, :]).astype(out_ref.dtype)


def _round_up(n, m):
    return ((n + m - 1) // m) * m


@jax.jit
def turbulence_forward(input1, input2, packed):
    """input1, input2: [B, 2] float32 -> output [B, 1] float32."""
    w_slab, b_slab = packed
    B = input1.shape[0]

    # Batch on the lane axis: single fused concat of the transposed inputs.
    xin = jnp.concatenate(
        [input1.T.astype(jnp.float32), input2.T.astype(jnp.float32)],
        axis=0)                                                   # [4, B]

    tb = min(_TB_MAX, _round_up(B, 128))     # lane-dense batch tile
    bp = _round_up(B, tb)                    # padded batch
    if bp != B:
        xin = jnp.pad(xin, ((0, 0), (0, bp - B)))

    out_t = pl.pallas_call(
        _mlp_kernel,
        out_shape=jax.ShapeDtypeStruct((1, bp), jnp.float32),
        grid=(pl.cdiv(bp, tb),),
        in_specs=[
            pl.BlockSpec((4, tb), lambda i: (0, i)),          # batch tile
            pl.BlockSpec(w_slab.shape, lambda i: (0, 0)),     # resident weights
            pl.BlockSpec(b_slab.shape, lambda i: (0, 0)),     # resident biases
        ],
        out_specs=pl.BlockSpec((1, tb), lambda i: (0, i)),
        compiler_params=pltpu.CompilerParams(
            dimension_semantics=("parallel",)),
    )(xin, w_slab, b_slab)

    return out_t[:, :B].T   # back to [B, 1]


def init_params(key):
    """PyTorch nn.Linear init: W [out, in], b [out], U(-1/sqrt(fan_in), +)."""
    dims = [(20, 2), (20, 2), (20, 40), (20, 20), (20, 20), (1, 20)]
    keys = jax.random.split(key, 2 * len(dims))
    params = []
    for i, (fan_out, fan_in) in enumerate(dims):
        bound = 1.0 / float(fan_in) ** 0.5
        w = jax.random.uniform(keys[2 * i], (fan_out, fan_in), jnp.float32,
                               minval=-bound, maxval=bound)
        b = jax.random.uniform(keys[2 * i + 1], (fan_out,), jnp.float32,
                               minval=-bound, maxval=bound)
        params.extend([w, b])
    return tuple(params)


def pack_params(params):
    """Pack the 6 Linear layers into one weight slab + one bias slab (once)."""
    (w1, b1, w2, b2, w3, b3, w4, b4, w5, b5, wo, bo) = params

    w_slab = jnp.zeros((_SLAB_ROWS, _SLAB_COLS), jnp.float32)
    w_slab = w_slab.at[_R12:_R12 + 20, 0:2].set(w1)        # hidden1 block
    w_slab = w_slab.at[_R12 + 20:_R12 + 40, 2:4].set(w2)   # hidden2 block
    w_slab = w_slab.at[_R3:_R3 + 20, 0:40].set(w3)
    w_slab = w_slab.at[_R4:_R4 + 20, 0:20].set(w4)
    w_slab = w_slab.at[_R5:_R5 + 20, 0:20].set(w5)
    w_slab = w_slab.at[_RO:_RO + 1, 0:20].set(wo)

    b_slab = jnp.zeros((_SLAB_ROWS, 1), jnp.float32)
    b_slab = b_slab.at[_R12:_R12 + 20, 0].set(b1)
    b_slab = b_slab.at[_R12 + 20:_R12 + 40, 0].set(b2)
    b_slab = b_slab.at[_R3:_R3 + 20, 0].set(b3)
    b_slab = b_slab.at[_R4:_R4 + 20, 0].set(b4)
    b_slab = b_slab.at[_R5:_R5 + 20, 0].set(b5)
    b_slab = b_slab.at[_RO:_RO + 1, 0].set(bo)
    return w_slab, b_slab


def reference_forward(input1, input2, params):
    """Pure-JAX reference replicating the PyTorch forward exactly."""
    (w1, b1, w2, b2, w3, b3, w4, b4, w5, b5, wo, bo) = params
    x1 = jnp.maximum(input1 @ w1.T + b1, 0.0)
    x2 = jnp.maximum(input2 @ w2.T + b2, 0.0)
    x = jnp.concatenate([x1, x2], axis=1)
    x = jnp.maximum(x @ w3.T + b3, 0.0)
    x = jnp.maximum(x @ w4.T + b4, 0.0)
    x = jnp.maximum(x @ w5.T + b5, 0.0)
    return x @ wo.T + bo


if __name__ == "__main__":
    key = jax.random.PRNGKey(0)
    k_params, k_in = jax.random.split(key)

    params = init_params(k_params)
    packed = pack_params(params)

    # Small batch + a non-multiple-of-tile batch to exercise padding/grid.
    for B in (8, 1000):
        ki1, ki2 = jax.random.split(jax.random.fold_in(k_in, B))
        input1 = jax.random.normal(ki1, (B, 2), jnp.float32)
        input2 = jax.random.normal(ki2, (B, 2), jnp.float32)

        out = jax.block_until_ready(turbulence_forward(input1, input2, packed))
        ref = reference_forward(input1, input2, params)

        assert out.shape == (B, 1), out.shape
        assert jnp.allclose(out, ref, atol=1e-5, rtol=1e-5)

    print("KERNEL_OK")
</pallas_src>

<mosaic_0001>
module attributes {stable_mosaic.version = 11 : i64} {
  func.func @_mlp_kernel(%arg0: i32, %arg1: memref<4x128xf32, #tpu.memory_space<vmem>>, %arg2: memref<120x128xf32, #tpu.memory_space<vmem>>, %arg3: memref<120x1xf32, #tpu.memory_space<vmem>>, %arg4: memref<1x128xf32, #tpu.memory_space<vmem>>) attributes {dimension_semantics = [#tpu.dimension_semantics<parallel>], iteration_bounds = array<i64: 1>, scalar_prefetch = 0 : i64, scratch_operands = 0 : i64, tpu.core_type = #tpu.core_type<tc>, window_params = [{transform_indices = @transform_0, window_bounds = array<i64: 4, 128>}, {pipeline_mode = #tpu.pipeline_mode<synchronous>, transform_indices = @transform_1, window_bounds = array<i64: 120, 128>}, {pipeline_mode = #tpu.pipeline_mode<synchronous>, transform_indices = @transform_2, window_bounds = array<i64: 120, 1>}, {transform_indices = @transform_3, window_bounds = array<i64: 1, 128>}]} {
    %c0 = arith.constant 0 : index
    %c0_0 = arith.constant 0 : index
    %0 = vector.load %arg1[%c0, %c0_0] : memref<4x128xf32, #tpu.memory_space<vmem>>, vector<4x128xf32>
    %c0_1 = arith.constant 0 : index
    %c0_2 = arith.constant 0 : index
    %1 = vector.load %arg2[%c0_1, %c0_2] : memref<120x128xf32, #tpu.memory_space<vmem>>, vector<40x4xf32>
    %cst = arith.constant dense<0.000000e+00> : vector<40x128xf32>
    %2 = tpu.matmul %1, %0, %cst {dimension_numbers = #tpu.dot_dimension_numbers<[1], [0], [0], [1], [0, 0, 1, 1], [], []>} : vector<40x4xf32>, vector<4x128xf32>, vector<40x128xf32> -> vector<40x128xf32>
    %c0_3 = arith.constant 0 : index
    %c0_4 = arith.constant 0 : index
    %3 = vector.load %arg3[%c0_3, %c0_4] : memref<120x1xf32, #tpu.memory_space<vmem>>, vector<40x1xf32>
    %4 = vector.broadcast %3 : vector<40x1xf32> to vector<40x128xf32>
    %5 = arith.addf %2, %4 : vector<40x128xf32>
    %cst_5 = arith.constant 0.000000e+00 : f32
    %6 = vector.broadcast %cst_5 : f32 to vector<40x128xf32>
    %7 = arith.maximumf %5, %6 : vector<40x128xf32>
    %c40 = arith.constant 40 : index
    %c0_6 = arith.constant 0 : index
    %8 = vector.load %arg2[%c40, %c0_6] : memref<120x128xf32, #tpu.memory_space<vmem>>, vector<20x40xf32>
    %cst_7 = arith.constant dense<0.000000e+00> : vector<20x128xf32>
    %9 = tpu.matmul %8, %7, %cst_7 {dimension_numbers = #tpu.dot_dimension_numbers<[1], [0], [0], [1], [0, 0, 1, 1], [], []>} : vector<20x40xf32>, vector<40x128xf32>, vector<20x128xf32> -> vector<20x128xf32>
    %c40_8 = arith.constant 40 : index
    %c0_9 = arith.constant 0 : index
    %10 = vector.load %arg3[%c40_8, %c0_9] : memref<120x1xf32, #tpu.memory_space<vmem>>, vector<20x1xf32>
    %11 = vector.broadcast %10 : vector<20x1xf32> to vector<20x128xf32>
    %12 = arith.addf %9, %11 : vector<20x128xf32>
    %cst_10 = arith.constant 0.000000e+00 : f32
    %13 = vector.broadcast %cst_10 : f32 to vector<20x128xf32>
    %14 = arith.maximumf %12, %13 : vector<20x128xf32>
    %c64 = arith.constant 64 : index
    %c0_11 = arith.constant 0 : index
    %15 = vector.load %arg2[%c64, %c0_11] : memref<120x128xf32, #tpu.memory_space<vmem>>, vector<20x20xf32>
    %cst_12 = arith.constant dense<0.000000e+00> : vector<20x128xf32>
    %16 = tpu.matmul %15, %14, %cst_12 {dimension_numbers = #tpu.dot_dimension_numbers<[1], [0], [0], [1], [0, 0, 1, 1], [], []>} : vector<20x20xf32>, vector<20x128xf32>, vector<20x128xf32> -> vector<20x128xf32>
    %c64_13 = arith.constant 64 : index
    %c0_14 = arith.constant 0 : index
    %17 = vector.load %arg3[%c64_13, %c0_14] : memref<120x1xf32, #tpu.memory_space<vmem>>, vector<20x1xf32>
    %18 = vector.broadcast %17 : vector<20x1xf32> to vector<20x128xf32>
    %19 = arith.addf %16, %18 : vector<20x128xf32>
    %cst_15 = arith.constant 0.000000e+00 : f32
    %20 = vector.broadcast %cst_15 : f32 to vector<20x128xf32>
    %21 = arith.maximumf %19, %20 : vector<20x128xf32>
    %c88 = arith.constant 88 : index
    %c0_16 = arith.constant 0 : index
    %22 = vector.load %arg2[%c88, %c0_16] : memref<120x128xf32, #tpu.memory_space<vmem>>, vector<20x20xf32>
    %cst_17 = arith.constant dense<0.000000e+00> : vector<20x128xf32>
    %23 = tpu.matmul %22, %21, %cst_17 {dimension_numbers = #tpu.dot_dimension_numbers<[1], [0], [0], [1], [0, 0, 1, 1], [], []>} : vector<20x20xf32>, vector<20x128xf32>, vector<20x128xf32> -> vector<20x128xf32>
    %c88_18 = arith.constant 88 : index
    %c0_19 = arith.constant 0 : index
    %24 = vector.load %arg3[%c88_18, %c0_19] : memref<120x1xf32, #tpu.memory_space<vmem>>, vector<20x1xf32>
    %25 = vector.broadcast %24 : vector<20x1xf32> to vector<20x128xf32>
    %26 = arith.addf %23, %25 : vector<20x128xf32>
    %cst_20 = arith.constant 0.000000e+00 : f32
    %27 = vector.broadcast %cst_20 : f32 to vector<20x128xf32>
    %28 = arith.maximumf %26, %27 : vector<20x128xf32>
    %c112 = arith.constant 112 : index
    %c0_21 = arith.constant 0 : index
    %29 = vector.load %arg2[%c112, %c0_21] : memref<120x128xf32, #tpu.memory_space<vmem>>, vector<1x20xf32>
    %cst_22 = arith.constant dense<0.000000e+00> : vector<1x128xf32>
    %30 = tpu.matmul %29, %28, %cst_22 {dimension_numbers = #tpu.dot_dimension_numbers<[1], [0], [0], [1], [0, 0, 1, 1], [], []>} : vector<1x20xf32>, vector<20x128xf32>, vector<1x128xf32> -> vector<1x128xf32>
    %c112_23 = arith.constant 112 : index
    %c0_24 = arith.constant 0 : index
    %31 = vector.load %arg3[%c112_23, %c0_24] : memref<120x1xf32, #tpu.memory_space<vmem>>, vector<1x1xf32>
    %32 = vector.broadcast %31 : vector<1x1xf32> to vector<1x128xf32>
    %33 = arith.addf %30, %32 : vector<1x128xf32>
    %c0_25 = arith.constant 0 : index
    %c0_26 = arith.constant 0 : index
    %34 = vector.load %arg4[%c0_25, %c0_26] : memref<1x128xf32, #tpu.memory_space<vmem>>, vector<1x128xf32>
    tpu.vector_store %arg4[%c0_25, %c0_26], %33 {strides = array<i32>} : memref<1x128xf32, #tpu.memory_space<vmem>>, vector<1x128xf32>,
    return
  }
  func.func @transform_0(%arg0: i32) -> (i32, i32) {
    %c0_i32 = arith.constant 0 : i32
    %c0_i32_0 = arith.constant 0 : i32
    return %c0_i32, %arg0 : i32, i32
  }
  func.func @transform_1(%arg0: i32) -> (i32, i32) {
    %c0_i32 = arith.constant 0 : i32
    %c0_i32_0 = arith.constant 0 : i32
    %c0_i32_1 = arith.constant 0 : i32
    return %c0_i32, %c0_i32_0 : i32, i32
  }
  func.func @transform_2(%arg0: i32) -> (i32, i32) {
    %c0_i32 = arith.constant 0 : i32
    %c0_i32_0 = arith.constant 0 : i32
    %c0_i32_1 = arith.constant 0 : i32
    return %c0_i32, %c0_i32_0 : i32, i32
  }
  func.func @transform_3(%arg0: i32) -> (i32, i32) {
    %c0_i32 = arith.constant 0 : i32
    %c0_i32_0 = arith.constant 0 : i32
    return %c0_i32, %arg0 : i32, i32
  }
}

</mosaic_0001>

<bundles_post_ra>
// kernel: turbulence_forward.1
= control target key start
LH: loop header
LB: loop body
LE: loop exit
PB: predicated region body
PF: predicated region fallthrough
CT: control target
= control target key end

     0   :  { %vm66_vm0 = vcmask 1043456   ;;  %vm50_vm1 = vcmask 31744   ;;  %v729_v0 = vmov 0.0   ;;  %vm730_vm2 = vmmov 0   ;;  %s909_s0 = inlined_call_operand.vmem [shape: f32[4,128], index: 0, kind: input, shape index: {}]   ;;  %s910_s1 = inlined_call_operand.vmem [shape: f32[120,128], index: 1, kind: input, shape index: {}]   ;;  %s911_s2 = inlined_call_operand.vmem [shape: f32[120,1], index: 2, kind: input, shape index: {}]   ;;  %s912_s3 = inlined_call_operand.vmem [shape: f32[1,128], index: 3, kind: output, shape index: {}]  }
   0x1   :  { %649 = vmatprep.subr.mxu0 %v729_v0  ;;  %v14_v1 = vld [vmem:[%s909_s0] sm:$0xf]  ;;  %651 = vmatprep.mubr.msk.f32.mxu0 %vm730_vm2, %v729_v0  ;;  %v731_v3 = vmov 0   ;;  %v22_v5 = vld [vmem:[%s911_s2 + $0x10] sm:$0xff]  ;;  %v16_v6 = vld [vmem:[%s910_s1 + $0x8] sm:$0xff]  ;;  %vm186_vm3 = vcmask 326656  }
   0x2   :  { %v15_v2 = vld [vmem:[%s910_s1] sm:$0xff]  ;;  %650 = vmatpush3.msk.msra.mxu0 %vm66_vm0, %v14_v1  ;;  %727 = vset.pattern.permute.xlu0 %v731_v3  ;;  %v23_v7 = vld [vmem:[%s911_s2 + $0x18] sm:$0xff]  ;;  %v21_v8 = vld [vmem:[%s911_s2 + $0x8] sm:$0xff]  ;;  %vm300_vm4 = vcmask 162816  }
   0x3   :  { %652 = vmatmul.mubr.msk.f32.vlgmr.msra.gmra.mxu0 %vm50_vm1, %v15_v2  ;;  %v24_v4 = vld [vmem:[%s911_s2 + $0x20] sm:$0xff]  ;;  %728 = vset.pattern.permute.xlu1 %v731_v3  ;;  %v17_v9 = vld [vmem:[%s910_s1 + $0x10] sm:$0xff]  ;;  %v170_v11 = vld [vmem:[%s911_s2 + $0x38] sm:$0xf] }
   0x4   :  { %654 = vmatprep.mubr.msk.f32.mxu0 %vm730_vm2, %v729_v0  ;;  %47 = vperm.xlu0 %727, %v24_v4   ;;  %v20_v10 = vld [vmem:[%s911_s2] sm:$0xff]  ;;  %v18_v12 = vld [vmem:[%s910_s1 + $0x18] sm:$0xff]  ;;  %v169_v13 = vld [vmem:[%s911_s2 + $0x30] sm:$0xff] }
   0x5   :  { %37 = vperm.xlu1 %728, %v22_v5   ;;  %666 = vmatprep.subr.mxu1 %v729_v0  ;;  %v168_v14 = vld [vmem:[%s911_s2 + $0x28] sm:$0xff]  ;;  %v19_v15 = vld [vmem:[%s910_s1 + $0x20] sm:$0xff]  ;;  %v284_v16 = vld [vmem:[%s911_s2 + $0x50] sm:$0xf] }
   0x6   :  { %676 = vmatprep.mubr.msk.f32.mxu1 %vm730_vm2, %v729_v0  ;;  %685 = vmatprep.subr.mxu0 %v729_v0  ;;  %v283_v17 = vld [vmem:[%s911_s2 + $0x48] sm:$0xff]  ;;  %v282_v18 = vld [vmem:[%s911_s2 + $0x40] sm:$0xff]  ;;  %v399_v21 = vld [vmem:[%s911_s2 + $0x58] sm:$0xff] }
   0x7   :  { %655 = vmatmul.mubr.msk.f32.gmra.mxu0 %vm50_vm1, %v16_v6  ;;  %v401_v19 = vld [vmem:[%s911_s2 + $0x68] sm:$0xf]  ;;  %v400_v20 = vld [vmem:[%s911_s2 + $0x60] sm:$0xff]  ;;  %v513_v22 = vld [vmem:[%s911_s2 + $0x70] sm:$0x1] }
   0x8   :  { %657 = vmatprep.mubr.msk.f32.mxu0 %vm730_vm2, %v729_v0  ;;  %42 = vperm.xlu0 %727, %v23_v7   ;;  %v165_v48 = vld [vmem:[%s910_s1 + $0x28] sm:$0xff]  ;;  %v166_v49 = vld [vmem:[%s910_s1 + $0x30] sm:$0xff]  ;;  %v167_v50 = vld [vmem:[%s910_s1 + $0x38] sm:$0xf] }
   0x9   :  { %32 = vperm.xlu1 %728, %v21_v8   ;;  %v279_v3 = vld [vmem:[%s910_s1 + $0x40] sm:$0xff]  ;;  %v280_v4 = vld [vmem:[%s910_s1 + $0x48] sm:$0xff]  ;;  %v281_v5 = vld [vmem:[%s910_s1 + $0x50] sm:$0xf] }
   0xb   :  { %658 = vmatmul.mubr.msk.f32.gmra.mxu0 %vm50_vm1, %v17_v9 }
   0xc   :  { %660 = vmatprep.mubr.msk.f32.mxu0 %vm730_vm2, %v729_v0  ;;  %27 = vperm.xlu0 %727, %v20_v10  }
   0xd   :  { %183 = vperm.xlu1 %728, %v170_v11  }
   0xf   :  { %661 = vmatmul.mubr.msk.f32.gmra.mxu0 %vm50_vm1, %v18_v12 }
  0x10   :  { %663 = vmatprep.mubr.msk.f32.mxu0 %vm730_vm2, %v729_v0  ;;  %178 = vperm.xlu0 %727, %v169_v13  }
  0x11   :  { %173 = vperm.xlu1 %728, %v168_v14  }
  0x13   :  { %664 = vmatmul.mubr.msk.f32.gmra.mxu0 %vm50_vm1, %v19_v15 }
  0x14   :  { %297 = vperm.xlu0 %727, %v284_v16   ;;  %691 = vmatprep.mubr.msk.f32.mxu0 %vm730_vm2, %v729_v0 }
  0x15   :  { %292 = vperm.xlu1 %728, %v283_v17  }
  0x18   :  { %287 = vperm.xlu0 %727, %v282_v18  }
  0x19   :  { %414 = vperm.xlu1 %728, %v401_v19  }
  0x1c   :  { %409 = vperm.xlu0 %727, %v400_v20  }
  0x1d   :  { %404 = vperm.xlu1 %728, %v399_v21   ;;  %v396_v21 = vld [vmem:[%s910_s1 + $0x58] sm:$0xff] }
  0x20   :  { %516 = vperm.xlu0 %727, %v513_v22   ;;  %v397_v22 = vld [vmem:[%s910_s1 + $0x60] sm:$0xff] }
  0x7f   :  { %v48_v28 = vpop.permute.xlu0 %47 }
  0x80   :  { %v38_v31 = vpop.permute.xlu1 %37 }
  0x83   :  { %v43_v33 = vpop.permute.xlu0 %42 }
  0x84   :  { %v33_v40 = vpop.permute.xlu1 %32 }
  0x87   :  { %v28_v43 = vpop.permute.xlu0 %27 }
  0x88   :  { %v184_v53 = vpop.permute.xlu1 %183 }
  0x8b   :  { %v179_v56 = vpop.permute.xlu0 %178 }
  0x8c   :  { %v174_v60 = vpop.permute.xlu1 %173 }
  0x8f   :  { %v298_v8 = vpop.permute.xlu0 %297 }
  0x90   :  { %v293_v11 = vpop.permute.xlu1 %292 }
  0x93   :  { %v288_v15 = vpop.permute.xlu0 %287 }
  0xc3   :  { %v136_v23 = vpop.f32.mrf.mxu0 }
  0xc4   :  { %v137_v44 = vadd.f32 %v136_v23, %v28_v43  ;;  %v398_v23 = vld [vmem:[%s910_s1 + $0x68] sm:$0xf] }
  0xc5   :  { %v653_v24 = vpop.f32.mrf.mxu0 }
  0xc6   :  { %v160_v47 = vmax.f32 %v137_v44, 0.0 }
  0xc7   :  { %v141_v25 = vpop.f32.mrf.mxu0 }
  0xc8   :  { %v142_v41 = vadd.f32 %v141_v25, %v33_v40 }
  0xc9   :  { %v656_v26 = vpop.f32.mrf.mxu0 }
  0xca   :  { %v161_v46 = vmax.f32 %v142_v41, 0.0  ;;  %v415_v26 = vpop.permute.xlu1 %414 }
  0xcb   :  { %v146_v27 = vpop.f32.mrf.mxu0 }
  0xcc   :  { %v147_v38 = vadd.f32 %v146_v27, %v38_v31 }
  0xcd   :  { %v659_v29 = vpop.f32.mrf.mxu0 }
  0xce   :  { %v162_v45 = vmax.f32 %v147_v38, 0.0  ;;  %v410_v29 = vpop.permute.xlu0 %409 }
  0xcf   :  { %v151_v30 = vpop.f32.mrf.mxu0 }
  0xd0   :  { %v152_v35 = vadd.f32 %v151_v30, %v43_v33  ;;  %v405_v33 = vpop.permute.xlu1 %404 }
  0xd1   :  { %v662_v32 = vpop.f32.mrf.mxu0 }
  0xd2   :  { %v163_v42 = vmax.f32 %v152_v35, 0.0  ;;  %v517_v40 = vpop.permute.xlu0 %516 }
  0xd3   :  { %v156_v34 = vpop.f32.mrf.mxu0 }
  0xd4   :  { %v157_v36 = vadd.f32 %v156_v34, %v48_v28 }
  0xd5   :  { %v665_v37 = vpop.f32.mrf.mxu0 }
  0xd6   :  { %v164_v39 = vmax.f32 %v157_v36, 0.0 }
  0xd8   :  { %667 = vmatpush3.msra.mxu1 %v164_v39  ;;  %v512_v39 = vld [vmem:[%s910_s1 + $0x70] sm:$0x1] }
  0xd9   :  { %668 = vmatprep.subr.mxu1 %v729_v0 }
  0xda   :  { %669 = vmatpush3.msra.mxu1 %v163_v42 }
  0xdb   :  { %670 = vmatprep.subr.mxu1 %v729_v0 }
  0xdc   :  { %671 = vmatpush3.msra.mxu1 %v162_v45 }
  0xdd   :  { %672 = vmatprep.subr.mxu1 %v729_v0 }
  0xde   :  { %673 = vmatpush3.msra.mxu1 %v161_v46 }
  0xdf   :  { %674 = vmatprep.subr.mxu1 %v729_v0 }
  0xe0   :  { %675 = vmatpush3.msra.mxu1 %v160_v47 }
  0xe1   :  { %677 = vmatmul.mubr.msk.f32.vlgmr.msra.gmra.mxu1 %vm186_vm3, %v165_v48  ;;  %700 = vmatprep.subr.mxu1 %v729_v0 }
  0xe2   :  { %679 = vmatprep.mubr.msk.f32.mxu1 %vm730_vm2, %v729_v0 }
  0xe5   :  { %680 = vmatmul.mubr.msk.f32.gmra.mxu1 %vm186_vm3, %v166_v49 }
  0xe6   :  { %682 = vmatprep.mubr.msk.f32.mxu1 %vm730_vm2, %v729_v0 }
  0xe9   :  { %683 = vmatmul.mubr.msk.f32.gmra.mxu1 %vm186_vm3, %v167_v50 }
  0xea   :  { %706 = vmatprep.mubr.msk.f32.mxu1 %vm730_vm2, %v729_v0 }
 0x1a1   :  { %v262_v51 = vpop.f32.mrf.mxu1 }
 0x1a2   :  { %v263_v62 = vadd.f32 %v262_v51, %v174_v60 }
 0x1a3   :  { %v678_v52 = vpop.f32.mrf.mxu1 }
 0x1a4   :  { %v276_v2 = vmax.f32 %v263_v62, 0.0 }
 0x1a5   :  { %v267_v54 = vpop.f32.mrf.mxu1 }
 0x1a6   :  { %v268_v58 = vadd.f32 %v267_v54, %v179_v56 }
 0x1a7   :  { %v681_v55 = vpop.f32.mrf.mxu1 }
 0x1a8   :  { %v277_v1 = vmax.f32 %v268_v58, 0.0 }
 0x1a9   :  { %v272_v57 = vpop.f32.mrf.mxu1 }
 0x1aa   :  { %v273_v59 = vadd.f32 %v272_v57, %v184_v53 }
 0x1ab   :  { %v684_v61 = vpop.f32.mrf.mxu1 }
 0x1ac   :  { %v278_v63 = vmax.f32 %v273_v59, 0.0 }
 0x1ae   :  { %686 = vmatpush3.msk.msra.mxu0 %vm66_vm0, %v278_v63 }
 0x1af   :  { %687 = vmatprep.subr.mxu0 %v729_v0 }
 0x1b0   :  { %688 = vmatpush3.msra.mxu0 %v277_v1 }
 0x1b1   :  { %689 = vmatprep.subr.mxu0 %v729_v0 }
 0x1b2   :  { %690 = vmatpush3.msra.mxu0 %v276_v2 }
 0x1b3   :  { %692 = vmatmul.mubr.msk.f32.vlgmr.msra.gmra.mxu0 %vm300_vm4, %v279_v3  ;;  %715 = vmatprep.subr.mxu0 %v729_v0 }
 0x1b4   :  { %694 = vmatprep.mubr.msk.f32.mxu0 %vm730_vm2, %v729_v0 }
 0x1b7   :  { %695 = vmatmul.mubr.msk.f32.gmra.mxu0 %vm300_vm4, %v280_v4 }
 0x1b8   :  { %697 = vmatprep.mubr.msk.f32.mxu0 %vm730_vm2, %v729_v0 }
 0x1bb   :  { %698 = vmatmul.mubr.msk.f32.gmra.mxu0 %vm300_vm4, %v281_v5 }
 0x1bc   :  { %721 = vmatprep.mubr.msk.f32.mxu0 %vm730_vm2, %v729_v0 }
 0x273   :  { %v379_v6 = vpop.f32.mrf.mxu0 }
 0x274   :  { %v380_v17 = vadd.f32 %v379_v6, %v288_v15 }
 0x275   :  { %v693_v7 = vpop.f32.mrf.mxu0 }
 0x276   :  { %v393_v20 = vmax.f32 %v380_v17, 0.0 }
 0x277   :  { %v384_v9 = vpop.f32.mrf.mxu0 }
 0x278   :  { %v385_v13 = vadd.f32 %v384_v9, %v293_v11 }
 0x279   :  { %v696_v10 = vpop.f32.mrf.mxu0 }
 0x27a   :  { %v394_v19 = vmax.f32 %v385_v13, 0.0 }
 0x27b   :  { %v389_v12 = vpop.f32.mrf.mxu0 }
 0x27c   :  { %v390_v14 = vadd.f32 %v389_v12, %v298_v8 }
 0x27d   :  { %v699_v16 = vpop.f32.mrf.mxu0 }
 0x27e   :  { %v395_v18 = vmax.f32 %v390_v14, 0.0 }
 0x280   :  { %701 = vmatpush3.msk.msra.mxu1 %vm66_vm0, %v395_v18 }
 0x281   :  { %702 = vmatprep.subr.mxu1 %v729_v0 }
 0x282   :  { %703 = vmatpush3.msra.mxu1 %v394_v19 }
 0x283   :  { %704 = vmatprep.subr.mxu1 %v729_v0 }
 0x284   :  { %705 = vmatpush3.msra.mxu1 %v393_v20 }
 0x285   :  { %707 = vmatmul.mubr.msk.f32.vlgmr.msra.gmra.mxu1 %vm300_vm4, %v396_v21 }
 0x286   :  { %709 = vmatprep.mubr.msk.f32.mxu1 %vm730_vm2, %v729_v0 }
 0x289   :  { %710 = vmatmul.mubr.msk.f32.gmra.mxu1 %vm300_vm4, %v397_v22 }
 0x28a   :  { %712 = vmatprep.mubr.msk.f32.mxu1 %vm730_vm2, %v729_v0 }
 0x28d   :  { %713 = vmatmul.mubr.msk.f32.gmra.mxu1 %vm300_vm4, %v398_v23 }
 0x345   :  { %v495_v24 = vpop.f32.mrf.mxu1 }
 0x346   :  { %v496_v35 = vadd.f32 %v495_v24, %v405_v33 }
 0x347   :  { %v708_v25 = vpop.f32.mrf.mxu1 }
 0x348   :  { %v509_v38 = vmax.f32 %v496_v35, 0.0 }
 0x349   :  { %v500_v27 = vpop.f32.mrf.mxu1 }
 0x34a   :  { %v501_v31 = vadd.f32 %v500_v27, %v410_v29 }
 0x34b   :  { %v711_v28 = vpop.f32.mrf.mxu1 }
 0x34c   :  { %v510_v37 = vmax.f32 %v501_v31, 0.0 }
 0x34d   :  { %v505_v30 = vpop.f32.mrf.mxu1 }
 0x34e   :  { %v506_v32 = vadd.f32 %v505_v30, %v415_v26 }
 0x34f   :  { %v714_v34 = vpop.f32.mrf.mxu1 }
 0x350   :  { %v511_v36 = vmax.f32 %v506_v32, 0.0 }
 0x352   :  { %716 = vmatpush3.msk.msra.mxu0 %vm66_vm0, %v511_v36 }
 0x353   :  { %717 = vmatprep.subr.mxu0 %v729_v0 }
 0x354   :  { %718 = vmatpush3.msra.mxu0 %v510_v37 }
 0x355   :  { %719 = vmatprep.subr.mxu0 %v729_v0 }
 0x356   :  { %720 = vmatpush3.msra.mxu0 %v509_v38 }
 0x357   :  { %722 = vmatmul.mubr.msk.f32.vlgmr.msra.gmra.mxu0 %vm300_vm4, %v512_v39 }
 0x417   :  { %v591_v41 = vpop.f32.mrf.mxu0 }
 0x418   :  { %v592_v42 = vadd.f32 %v591_v41, %v517_v40 }
 0x419   :  { %v723_v43 = vpop.f32.mrf.mxu0 }
 0x41a   :  { %595 = vst [vmem:[%s912_s3] sm:$0x1] %v592_v42 }

</bundles_post_ra>
